<compile_context>
chip_gen: v7x
topology: tpu7x:2x2x1
jax: 0.10.0
libtpu: 0.0.40
codegen_flags: <defaults>
</compile_context>

<pallas_src>
import functools
import math
import random

import jax
import jax.numpy as jnp
from jax.experimental import pallas as pl
from jax.experimental.pallas import tpu as pltpu


def _conv_matmul_kernel(w_ref, b_ref, p_ref, o_ref):
    # w_ref: (C_out, K_pad) full weight (resident, constant index_map)
    # b_ref: (C_out, 1)     bias       (resident, constant index_map)
    # p_ref: (K_pad, tn)    im2col patch tile (leading batch dim squeezed)
    # o_ref: (C_out, tn)    output tile
    acc = jnp.dot(w_ref[...], p_ref[...], preferred_element_type=jnp.float32)
    o_ref[...] = (acc + b_ref[...].astype(jnp.float32)).astype(o_ref.dtype)


def _round_up(x, m):
    return (x + m - 1) // m * m


@functools.partial(jax.jit, static_argnames=("k",))
def rand_conv3d(x, weight, bias, *, k):
    """3D conv, stride 1, padding k//2, with bias.  x: (N, C_in, D, H, W)."""
    N, C_in, D, H, W = x.shape
    C_out = weight.shape[0]
    # padding k//2 only reproduces PyTorch "same" semantics for odd k
    assert k % 2 == 1, "MultiScaleRandConv3d uses odd kernel sizes"
    p = k // 2
    S = D * H * W
    K = C_in * k * k * k

    # --- K padding to a multiple of 8 by appending whole zero taps ----------
    # (block K dim == full array dim is legal regardless, so the fallback of
    #  leaving K unpadded is also fine; zero taps keep a single
    #  materialization of the patch matrix, no second pad pass.)
    n_zero_taps, K_pad = 0, K
    if K % 8 != 0:
        for n in range(1, 9):
            if (K + n * C_in) % 8 == 0:
                n_zero_taps, K_pad = n, K + n * C_in
                break

    # --- im2col patch matrix (N, K_pad, S), tap-major / channel-minor -------
    # Under jit the pad + k^3 static slices + stack fuse into the single
    # materialization of `pat`.
    x_pad = jnp.pad(x, ((0, 0), (0, 0), (p, p), (p, p), (p, p)))
    wins = []
    for kd in range(k):
        for kh in range(k):
            for kw in range(k):
                wins.append(x_pad[:, :, kd:kd + D, kh:kh + H, kw:kw + W])
    if n_zero_taps:
        zero_win = jnp.zeros((N, C_in, D, H, W), dtype=x.dtype)
        wins.extend([zero_win] * n_zero_taps)
    pat = jnp.stack(wins, axis=1)            # (N, n_taps, C_in, D, H, W)
    pat = pat.reshape(N, K_pad, S)           # row = tap*C_in + c_in

    # weight in matching (tap-major, channel-minor) column order
    w2 = jnp.transpose(weight, (0, 2, 3, 4, 1)).reshape(C_out, K)
    if K_pad > K:
        w2 = jnp.pad(w2, ((0, 0), (0, K_pad - K)))     # tiny, negligible
    b2 = bias.reshape(C_out, 1)

    # --- spatial tiling: lane-dense tn, minimal padding ---------------------
    TN_MAX = 2048                       # per-step working set stays << 40 MiB
    tn = min(TN_MAX, _round_up(S, 128))
    S_pad = _round_up(S, tn)
    if S_pad > S:
        pat = jnp.pad(pat, ((0, 0), (0, 0), (0, S_pad - S)))

    grid = (N, S_pad // tn)

    out_flat = pl.pallas_call(
        _conv_matmul_kernel,
        out_shape=jax.ShapeDtypeStruct((N, C_out, S_pad), x.dtype),
        grid_spec=pltpu.PrefetchScalarGridSpec(
            num_scalar_prefetch=0,
            grid=grid,
            in_specs=[
                pl.BlockSpec((C_out, K_pad), lambda n, s: (0, 0)),
                pl.BlockSpec((C_out, 1), lambda n, s: (0, 0)),
                pl.BlockSpec((None, K_pad, tn), lambda n, s: (n, 0, s)),
            ],
            out_specs=pl.BlockSpec((None, C_out, tn), lambda n, s: (n, 0, s)),
        ),
        compiler_params=pltpu.CompilerParams(
            dimension_semantics=("parallel", "parallel"),
            vmem_limit_bytes=48 * 1024 * 1024),
        cost_estimate=pl.CostEstimate(
            flops=2 * N * C_out * K_pad * S_pad,
            transcendentals=0,
            bytes_accessed=4 * (N * K_pad * S_pad + C_out * K_pad + C_out
                                + N * C_out * S_pad)),
    )(w2, b2, pat)

    return out_flat[:, :, :S].reshape(N, C_out, D, H, W)


def init_randconv3d_params(key, in_ch, out_ch, k):
    """Deterministic re-implementation of RandConv3d.randomize():
    kaiming_normal_ (gain('conv3d') == 1, fan_in mode) for the weight and
    uniform(-1/sqrt(fan_in), 1/sqrt(fan_in)) for the bias."""
    fan_in = in_ch * k ** 3
    std = 1.0 / math.sqrt(fan_in)
    k_w, k_b = jax.random.split(key)
    weight = std * jax.random.normal(k_w, (out_ch, in_ch, k, k, k),
                                     dtype=jnp.float32)
    bound = 1.0 / math.sqrt(fan_in)
    bias = jax.random.uniform(k_b, (out_ch,), minval=-bound, maxval=bound,
                              dtype=jnp.float32)
    return weight, bias


class MultiScaleRandConv3dPallas:
    """Holds one RandConv3d per kernel size; forward applies the currently
    selected scale (chosen at randomize(), as in the PyTorch module).
    clamp_output defaults to False in the reference module, which is the path
    implemented here."""
    # TODO(synk): clamp_output='clamp'/'norm' post-processing branches are not
    # implemented (module default is clamp_output=False).

    def __init__(self, key, in_channels, out_channels, kernel_sizes):
        self.kernel_sizes = tuple(kernel_sizes)
        assert all(ks % 2 == 1 for ks in self.kernel_sizes), \
            "padding=k//2 'same' semantics requires odd kernel sizes"
        keys = jax.random.split(key, len(self.kernel_sizes))
        self.params = {
            ks: init_randconv3d_params(kk, in_channels, out_channels, ks)
            for ks, kk in zip(self.kernel_sizes, keys)
        }
        self.randomize()

    def randomize(self):
        self.current_scale = self.kernel_sizes[
            random.randint(0, len(self.kernel_sizes) - 1)]
        # TODO(synk): PyTorch re-draws the selected conv's weights here; we
        # keep the deterministic init drawn in __init__ instead of re-sampling.

    def __call__(self, x):
        w, b = self.params[self.current_scale]
        return rand_conv3d(x, w, b, k=self.current_scale)


if __name__ == "__main__":
    random.seed(0)          # deterministic scale selection
    key = jax.random.PRNGKey(0)
    k_params, k_x = jax.random.split(key)

    N, C_in, C_out = 2, 4, 4
    D = H = W = 8
    kernel_sizes = (1, 3, 5)

    module = MultiScaleRandConv3dPallas(k_params, C_in, C_out, kernel_sizes)
    x = jax.random.normal(k_x, (N, C_in, D, H, W), dtype=jnp.float32)

    # Run the randomly selected scale plus every scale; check each against
    # XLA's conv (stride 1, padding k//2, + bias).
    for ks in kernel_sizes:
        module.current_scale = ks
        out = jax.block_until_ready(module(x))
        w, b = module.params[ks]
        ref = jax.lax.conv_general_dilated(
            x, w, window_strides=(1, 1, 1), padding="SAME",
            dimension_numbers=("NCDHW", "OIDHW", "NCDHW"))
        ref = ref + b[None, :, None, None, None]
        assert out.shape == (N, C_out, D, H, W)
        assert jnp.allclose(out, ref, atol=1e-4, rtol=1e-4), f"mismatch k={ks}"

    print("KERNEL_OK")
</pallas_src>

<mosaic_0001>
module attributes {stable_mosaic.version = 11 : i64} {
  func.func @_conv_matmul_kernel(%arg0: i32, %arg1: i32, %arg2: memref<4x8xf32, #tpu.memory_space<vmem>>, %arg3: memref<4x1xf32, #tpu.memory_space<vmem>>, %arg4: memref<1x8x512xf32, #tpu.memory_space<vmem>>, %arg5: memref<1x4x512xf32, #tpu.memory_space<vmem>>) attributes {dimension_semantics = [#tpu.dimension_semantics<parallel>, #tpu.dimension_semantics<parallel>], iteration_bounds = array<i64: 2, 1>, scalar_prefetch = 0 : i64, scratch_operands = 0 : i64, tpu.core_type = #tpu.core_type<tc>, window_params = [{pipeline_mode = #tpu.pipeline_mode<synchronous>, transform_indices = @transform_0, window_bounds = array<i64: 4, 8>}, {pipeline_mode = #tpu.pipeline_mode<synchronous>, transform_indices = @transform_1, window_bounds = array<i64: 4, 1>}, {transform_indices = @transform_2, window_bounds = array<i64: 1, 8, 512>}, {transform_indices = @transform_3, window_bounds = array<i64: 1, 4, 512>}]} {
    %c0 = arith.constant 0 : index
    %c0_0 = arith.constant 0 : index
    %0 = vector.load %arg2[%c0, %c0_0] : memref<4x8xf32, #tpu.memory_space<vmem>>, vector<4x8xf32>
    %c0_1 = arith.constant 0 : index
    %c0_2 = arith.constant 0 : index
    %c0_3 = arith.constant 0 : index
    %1 = vector.load %arg4[%c0_1, %c0_2, %c0_3] : memref<1x8x512xf32, #tpu.memory_space<vmem>>, vector<1x8x512xf32>
    %2 = vector.shape_cast %1 : vector<1x8x512xf32> to vector<8x512xf32>
    %cst = arith.constant dense<0.000000e+00> : vector<4x512xf32>
    %3 = tpu.matmul %0, %2, %cst {dimension_numbers = #tpu.dot_dimension_numbers<[1], [0], [0], [1], [0, 0, 1, 1], [], []>} : vector<4x8xf32>, vector<8x512xf32>, vector<4x512xf32> -> vector<4x512xf32>
    %c0_4 = arith.constant 0 : index
    %c0_5 = arith.constant 0 : index
    %4 = vector.load %arg3[%c0_4, %c0_5] : memref<4x1xf32, #tpu.memory_space<vmem>>, vector<4x1xf32>
    %5 = vector.broadcast %4 : vector<4x1xf32> to vector<4x512xf32>
    %6 = arith.addf %3, %5 : vector<4x512xf32>
    %c0_6 = arith.constant 0 : index
    %c0_7 = arith.constant 0 : index
    %c0_8 = arith.constant 0 : index
    %7 = vector.load %arg5[%c0_6, %c0_7, %c0_8] : memref<1x4x512xf32, #tpu.memory_space<vmem>>, vector<1x4x512xf32>
    %8 = vector.shape_cast %7 : vector<1x4x512xf32> to vector<4x512xf32>
    %9 = vector.shape_cast %6 : vector<4x512xf32> to vector<1x4x512xf32>
    tpu.vector_store %arg5[%c0_6, %c0_7, %c0_8], %9 {strides = array<i32>} : memref<1x4x512xf32, #tpu.memory_space<vmem>>, vector<1x4x512xf32>,
    return
  }
  func.func @transform_0(%arg0: i32, %arg1: i32) -> (i32, i32) {
    %c0_i32 = arith.constant 0 : i32
    %c0_i32_0 = arith.constant 0 : i32
    %c0_i32_1 = arith.constant 0 : i32
    return %c0_i32, %c0_i32_0 : i32, i32
  }
  func.func @transform_1(%arg0: i32, %arg1: i32) -> (i32, i32) {
    %c0_i32 = arith.constant 0 : i32
    %c0_i32_0 = arith.constant 0 : i32
    %c0_i32_1 = arith.constant 0 : i32
    return %c0_i32, %c0_i32_0 : i32, i32
  }
  func.func @transform_2(%arg0: i32, %arg1: i32) -> (i32, i32, i32) {
    %c0_i32 = arith.constant 0 : i32
    %c0_i32_0 = arith.constant 0 : i32
    return %arg0, %c0_i32, %arg1 : i32, i32, i32
  }
  func.func @transform_3(%arg0: i32, %arg1: i32) -> (i32, i32, i32) {
    %c0_i32 = arith.constant 0 : i32
    %c0_i32_0 = arith.constant 0 : i32
    return %arg0, %c0_i32, %arg1 : i32, i32, i32
  }
}

</mosaic_0001>

<bundles_post_ra>
// kernel: rand_conv3d.1
= control target key start
LH: loop header
LB: loop body
LE: loop exit
PB: predicated region body
PF: predicated region fallthrough
CT: control target
= control target key end

     0   :  { %s552_s12 = smov 0   ;;  %s554_s13 = smov 0   ;;  %s595_s0 = inlined_call_operand.vmem [shape: f32[4,8], index: 0, kind: input, shape index: {}]   ;;  %s596_s1 = inlined_call_operand.vmem [shape: f32[4,1], index: 1, kind: input, shape index: {}]   ;;  %s597_s2 = inlined_call_operand.vmem [shape: f32[2,8,512], index: 2, kind: input, shape index: {}]   ;;  %s598_s3 = inlined_call_operand.vmem [shape: f32[2,4,512], index: 3, kind: output, shape index: {}]  }
   0x1   :  { %s556_s14 = smov 0  }
   0x2 LB: > { %s25_s15 = sadd.s32 1, %s524_s13  ;;  %p468_p0 = scmp.ge.s32.totalorder %s528_s14, 1  ;;  %s528_s14 = sphi %s556_s14, %s13_s14   ;;  %s524_s13 = sphi %s554_s13, %s600_s13   ;;  %s520_s12 = sphi %s552_s12, %s599_s12  }
   0x3   : > { %p27_p1 = scmp.ge.s32.totalorder %s25_s15, 2  ;;  %p158_p2 = scmp.lt.s32.totalorder %s528_s14, 3 }
   0x5   : > { %s602_s15 = smov (%p27_p1, %s25_s15), 0  ;;  %p159_p3 = pnand %p468_p0, %p158_p2 }
   0x6   : > { %p191_p4 = scmp.lt.s32.totalorder (!%p159_p3), %s520_s12, 1  ;;  %v530_v0 = vmov (!%p159_p3), 0.0   ;;  %v215_v1 = vld [vmem:[%s596_s1] sm:$0xf] (!%p159_p3)  ;;  %v531_v2 = vmov (!%p159_p3), 0   ;;  %vm221_vm0 = vcmask (!%p159_p3), 64512  }
   0x7   : > { %162 = sbr.rel (%p159_p3) target bundleno = 238 (0xee), region = 32  ;;  %289 = vmatprep.mubr.f32.mxu0 (!%p159_p3), %v530_v0  ;;  %360 = vmatprep.mubr.f32.mxu1 (!%p159_p3), %v530_v0  ;;  %v210_v3 = vld [vmem:[%s595_s0] sm:$0xf] (!%p159_p3) }
   0x8   : > { %505 = vset.pattern.permute.xlu0 (!%p159_p3), %v531_v2 }
   0x9   : > { %218 = vperm.xlu0 (!%p159_p3), %505, %v215_v1  }
   0xe   : > { %s604_s12 = smov (!%p191_p4, %s520_s12), 1 }
   0xf   : > { %s477_s18 = sshll.u32 %s604_s12, 5  ;;  %s478_s24 = sshll.u32 %s604_s12, 4 }
  0x10   : > { %s198_s21 = scalar_lea.vmem %s597_s2, %s477_s18  ;;  %s208_s27 = scalar_lea.vmem %s598_s3, %s478_s24 }
  0x11   : > { %v212_v4 = vld [vmem:[%s198_s21 + $0x8] sm:$0xff]  ;;  %v214_v5 = vld [vmem:[%s198_s21 + $0x18] sm:$0xff]  ;;  %v211_v6 = vld [vmem:[%s198_s21] sm:$0xff] }
  0x12   : > { %225 = vmatprep.subr.mxu0 %v212_v4  ;;  %296 = vmatprep.subr.mxu1 %v214_v5  ;;  %v213_v7 = vld [vmem:[%s198_s21 + $0x10] sm:$0xff] }
  0x13   : > { %226 = vmatpush1.msra.mxu0 %v211_v6  ;;  %297 = vmatpush1.msra.mxu1 %v213_v7 }
  0x14   : > { %473 = vmatmul.mubr.msk.f32.vlgmr.msra.gmra.mrb[0].mxu0 %vm221_vm0, %v210_v3  ;;  %474 = vmatmul.mubr.msk.f32.vlgmr.msra.gmra.mrb[0].mxu1 %vm221_vm0, %v210_v3 }
  0x88   : > { %v219_v8 = vpop.permute.xlu0 %218 }
  0xe7   : > { %v291_v9 = vpop.f32.mrb[0].mxu0  ;;  %v362_v10 = vpop.f32.mrb[0].mxu1 }
  0xe8   : > { %v292_v11 = vadd.f32 %v291_v9, %v219_v8  ;;  %v363_v12 = vadd.f32 %v362_v10, %v219_v8  ;;  %v293_v13 = vpop.f32.mrb[1].mxu0  ;;  %v364_v14 = vpop.f32.mrb[1].mxu1 }
  0xe9   : > { %v294_v15 = vadd.f32 %v293_v13, %v219_v8  ;;  %v365_v16 = vadd.f32 %v364_v14, %v219_v8 }
  0xeb   : > { %v371_v17 = vcombine.low %v292_v11, %v294_v15  ;;  %v372_v18 = vcombine.low %v363_v12, %v365_v16 }
  0xed   : > { %375 = vst [vmem:[%s208_s27] sm:$0xff] %v371_v17  ;;  %376 = vst [vmem:[%s208_s27 + $0x8] sm:$0xff] %v372_v18 }
  0xee PF: > { %s13_s14 = sadd.s32 1, %s528_s14   ;;  %s599_s12 = smov %s524_s13 }
  0xef   : > { %p10_p5 = scmp.ge.s32.totalorder %s13_s14, 4   ;;  %s600_s13 = smov %s602_s15 }
  0xf1   :  { %12 = sbr.rel (!%p10_p5) target bundleno = 2 (0x2), region = 62 }

</bundles_post_ra>
